<compile_context>
chip_gen: v7x
topology: tpu7x:2x2x1
jax: 0.10.0
libtpu: 0.0.40
codegen_flags: <defaults>
</compile_context>

<pallas_src>
import jax
import jax.numpy as jnp
from jax.experimental import pallas as pl
from jax.experimental.pallas import tpu as pltpu
import numpy as np

# ---------------- problem sizes (small, consistent with the module) ----------------
B = 2            # batch
C = 4            # input channels
H = W = 16       # spatial
HW = H * W
BHW = B * HW     # 512 -> lane axis inside the kernel
F = 32           # hidden features of the counter-stream model
N_INST = 8       # n_instructions
# NOTE: for this synthetic counter-stream the BU pass depends only on x, so
# model.clear() (skip_lateral=True) yields identical numbers.
# TODO(synk): stateful cross-iteration laterals of the original Counter-Stream are not modeled.


def _instructor_kernel(x_ref,        # (C, B*HW)      input, channels on sublanes, B*HW on lanes
                       wbu_ref,      # (F, C)         BU 1x1 conv weight (transposed)
                       bbu_ref,      # (F, 1)         BU bias
                       wtd_ref,      # (F, N_INST)    TD instruction embedding (transposed)
                       btd_ref,      # (F, 1)         TD bias
                       wlat_ref,     # (F, 1)         lateral gate
                       whead_ref,    # (N_INST, F)    td_head 1x1 conv weight (transposed)
                       bhead_ref,    # (N_INST, 1)    td_head bias
                       o_ref):       # (N_INST, B*HW) selected TD map per instruction
    x = x_ref[...]                                                      # (C, BHW)

    # --- BU pass (instruction-invariant, computed once) ---
    bu = jnp.dot(wbu_ref[...], x, preferred_element_type=jnp.float32)   # (F, BHW)
    bu = jnp.maximum(bu + bbu_ref[...], 0.0)
    bu_lat = bu * wlat_ref[...]                                         # lateral gate, (F, BHW)

    # TD embeddings for every instruction: instructions == eye, so the embedding
    # of instruction n is just column n of W_td^T (+ bias).  No one-hot matmul.
    emb_all = wtd_ref[...] + btd_ref[...]                               # (F, N_INST)
    w_head = whead_ref[...]                                             # (N_INST, F)
    b_head = bhead_ref[...]                                             # (N_INST, 1)

    rows = []
    for n in range(N_INST):                 # static unroll over the instruction sequence
        # --- TD pass for instruction n ---
        td = jnp.maximum(bu_lat + emb_all[:, n:n + 1], 0.0)             # (F, BHW)
        # --- td_head restricted to the selected class channel (idx == n) ---
        sel = jnp.dot(w_head[n:n + 1, :], td,
                      preferred_element_type=jnp.float32) + b_head[n:n + 1, :]   # (1, BHW)
        rows.append(sel)

    # single lane-dense (8, 512) slab store
    o_ref[...] = jnp.concatenate(rows, axis=0)


def sequential_instructor_forward(x_nchw, params):
    """x_nchw: (B, C, H, W) float32  ->  (B, N_INST, H, W) float32."""
    instructions, w_bu, b_bu, w_td, b_td, w_lat, w_head, b_head = params
    del instructions  # identity one-hot; class index == instruction index inside the kernel

    # NCHW -> (C, B*HW): channels on sublanes, batch*spatial on lanes (glue, plain JAX)
    x_t = jnp.transpose(x_nchw, (1, 0, 2, 3)).reshape(C, BHW)

    # parameter layout plumbing (done once, tiny)
    w_bu_t = w_bu.T          # (F, C)
    b_bu_t = b_bu.T          # (F, 1)
    w_td_t = w_td.T          # (F, N_INST)
    b_td_t = b_td.T          # (F, 1)
    w_lat_t = w_lat.T        # (F, 1)
    w_head_t = w_head.T      # (N_INST, F)
    b_head_t = b_head.T      # (N_INST, 1)

    vmem = pl.BlockSpec(memory_space=pltpu.MemorySpace.VMEM)
    out = pl.pallas_call(
        _instructor_kernel,
        out_shape=jax.ShapeDtypeStruct((N_INST, BHW), jnp.float32),
        in_specs=[vmem] * 8,
        out_specs=vmem,
    )(x_t, w_bu_t, b_bu_t, w_td_t, b_td_t, w_lat_t, w_head_t, b_head_t)

    # (N_INST, B*HW) -> (B, N_INST, H, W)   == torch.stack(td, dim=1)
    return jnp.transpose(out.reshape(N_INST, B, HW), (1, 0, 2)).reshape(B, N_INST, H, W)


def reference_forward(x_nchw, params):
    """Pure-JAX reference mirroring the PyTorch feed_forward loop."""
    instructions, w_bu, b_bu, w_td, b_td, w_lat, w_head, b_head = params
    x = jnp.transpose(x_nchw, (0, 2, 3, 1)).reshape(B, HW, C)
    outs = []
    for i in range(N_INST):
        inst = instructions[i]                                   # (N_INST,) one-hot
        bu = jax.nn.relu(x @ w_bu + b_bu)                        # (B, HW, F)
        td_emb = inst @ w_td + b_td[0]                           # (F,)
        td = jax.nn.relu(bu * w_lat[0] + td_emb[None, None, :])  # (B, HW, F)
        head = td @ w_head + b_head[0]                           # (B, HW, N_INST)
        idx = jnp.argmax(inst)
        outs.append(head[:, :, idx])                             # (B, HW)
    td_stack = jnp.stack(outs, axis=1)                           # (B, N_INST, HW)
    return td_stack.reshape(B, N_INST, H, W)


def make_params():
    """Deterministic synthetic parameters (no checkpoint loading)."""
    key = jax.random.PRNGKey(42)
    k1, k2, k3, k4, k5, k6, k7 = jax.random.split(key, 7)
    instructions = jnp.eye(N_INST, dtype=jnp.float32)            # registered buffer (one-hot)
    w_bu = jax.random.normal(k1, (C, F), jnp.float32) * 0.2
    b_bu = jax.random.normal(k2, (1, F), jnp.float32) * 0.05
    w_td = jax.random.normal(k3, (N_INST, F), jnp.float32) * 0.2
    b_td = jax.random.normal(k4, (1, F), jnp.float32) * 0.05
    w_lat = jax.random.normal(k5, (1, F), jnp.float32) * 0.3 + 1.0
    w_head = jax.random.normal(k6, (F, N_INST), jnp.float32) * 0.2
    b_head = jax.random.normal(k7, (1, N_INST), jnp.float32) * 0.05
    return (instructions, w_bu, b_bu, w_td, b_td, w_lat, w_head, b_head)


if __name__ == "__main__":
    params = make_params()
    x = jax.random.normal(jax.random.PRNGKey(0), (B, C, H, W), jnp.float32)

    out = sequential_instructor_forward(x, params)
    out = jax.block_until_ready(out)
    assert out.shape == (B, N_INST, H, W), out.shape

    ref = jax.block_until_ready(reference_forward(x, params))
    np.testing.assert_allclose(np.asarray(out), np.asarray(ref), rtol=1e-5, atol=1e-5)

    print("KERNEL_OK")
</pallas_src>

<mosaic_0001>
module attributes {stable_mosaic.version = 11 : i64} {
  func.func @_instructor_kernel(%arg0: memref<4x512xf32, #tpu.memory_space<vmem>>, %arg1: memref<32x4xf32, #tpu.memory_space<vmem>>, %arg2: memref<32x1xf32, #tpu.memory_space<vmem>>, %arg3: memref<32x8xf32, #tpu.memory_space<vmem>>, %arg4: memref<32x1xf32, #tpu.memory_space<vmem>>, %arg5: memref<32x1xf32, #tpu.memory_space<vmem>>, %arg6: memref<8x32xf32, #tpu.memory_space<vmem>>, %arg7: memref<8x1xf32, #tpu.memory_space<vmem>>, %arg8: memref<8x512xf32, #tpu.memory_space<vmem>>) attributes {dimension_semantics = [], scalar_prefetch = 0 : i64, scratch_operands = 0 : i64, tpu.core_type = #tpu.core_type<tc>} {
    %c0 = arith.constant 0 : index
    %c0_0 = arith.constant 0 : index
    %0 = vector.load %arg0[%c0, %c0_0] : memref<4x512xf32, #tpu.memory_space<vmem>>, vector<4x512xf32>
    %c0_1 = arith.constant 0 : index
    %c0_2 = arith.constant 0 : index
    %1 = vector.load %arg1[%c0_1, %c0_2] : memref<32x4xf32, #tpu.memory_space<vmem>>, vector<32x4xf32>
    %cst = arith.constant dense<0.000000e+00> : vector<32x512xf32>
    %2 = tpu.matmul %1, %0, %cst {dimension_numbers = #tpu.dot_dimension_numbers<[1], [0], [0], [1], [0, 0, 1, 1], [], []>} : vector<32x4xf32>, vector<4x512xf32>, vector<32x512xf32> -> vector<32x512xf32>
    %c0_3 = arith.constant 0 : index
    %c0_4 = arith.constant 0 : index
    %3 = vector.load %arg2[%c0_3, %c0_4] : memref<32x1xf32, #tpu.memory_space<vmem>>, vector<32x1xf32>
    %4 = vector.broadcast %3 : vector<32x1xf32> to vector<32x512xf32>
    %5 = arith.addf %2, %4 : vector<32x512xf32>
    %cst_5 = arith.constant 0.000000e+00 : f32
    %6 = vector.broadcast %cst_5 : f32 to vector<32x512xf32>
    %7 = arith.maximumf %5, %6 : vector<32x512xf32>
    %c0_6 = arith.constant 0 : index
    %c0_7 = arith.constant 0 : index
    %8 = vector.load %arg5[%c0_6, %c0_7] : memref<32x1xf32, #tpu.memory_space<vmem>>, vector<32x1xf32>
    %9 = vector.broadcast %8 : vector<32x1xf32> to vector<32x512xf32>
    %10 = arith.mulf %7, %9 : vector<32x512xf32>
    %c0_8 = arith.constant 0 : index
    %c0_9 = arith.constant 0 : index
    %11 = vector.load %arg3[%c0_8, %c0_9] : memref<32x8xf32, #tpu.memory_space<vmem>>, vector<32x8xf32>
    %c0_10 = arith.constant 0 : index
    %c0_11 = arith.constant 0 : index
    %12 = vector.load %arg4[%c0_10, %c0_11] : memref<32x1xf32, #tpu.memory_space<vmem>>, vector<32x1xf32>
    %13 = vector.broadcast %12 : vector<32x1xf32> to vector<32x8xf32>
    %14 = arith.addf %11, %13 : vector<32x8xf32>
    %c0_12 = arith.constant 0 : index
    %c0_13 = arith.constant 0 : index
    %15 = vector.load %arg6[%c0_12, %c0_13] : memref<8x32xf32, #tpu.memory_space<vmem>>, vector<8x32xf32>
    %c0_14 = arith.constant 0 : index
    %c0_15 = arith.constant 0 : index
    %16 = vector.load %arg7[%c0_14, %c0_15] : memref<8x1xf32, #tpu.memory_space<vmem>>, vector<8x1xf32>
    %17 = vector.extract_strided_slice %14 {offsets = [0, 0], sizes = [32, 1], strides = [1, 1]} : vector<32x8xf32> to vector<32x1xf32>
    %18 = vector.broadcast %17 : vector<32x1xf32> to vector<32x512xf32>
    %19 = arith.addf %10, %18 : vector<32x512xf32>
    %cst_16 = arith.constant 0.000000e+00 : f32
    %20 = vector.broadcast %cst_16 : f32 to vector<32x512xf32>
    %21 = arith.maximumf %19, %20 : vector<32x512xf32>
    %22 = vector.extract_strided_slice %15 {offsets = [0, 0], sizes = [1, 32], strides = [1, 1]} : vector<8x32xf32> to vector<1x32xf32>
    %cst_17 = arith.constant dense<0.000000e+00> : vector<1x512xf32>
    %23 = tpu.matmul %22, %21, %cst_17 {dimension_numbers = #tpu.dot_dimension_numbers<[1], [0], [0], [1], [0, 0, 1, 1], [], []>} : vector<1x32xf32>, vector<32x512xf32>, vector<1x512xf32> -> vector<1x512xf32>
    %24 = vector.extract_strided_slice %16 {offsets = [0, 0], sizes = [1, 1], strides = [1, 1]} : vector<8x1xf32> to vector<1x1xf32>
    %25 = vector.broadcast %24 : vector<1x1xf32> to vector<1x512xf32>
    %26 = arith.addf %23, %25 : vector<1x512xf32>
    %27 = vector.extract_strided_slice %14 {offsets = [0, 1], sizes = [32, 1], strides = [1, 1]} : vector<32x8xf32> to vector<32x1xf32>
    %28 = vector.broadcast %27 : vector<32x1xf32> to vector<32x512xf32>
    %29 = arith.addf %10, %28 : vector<32x512xf32>
    %cst_18 = arith.constant 0.000000e+00 : f32
    %30 = vector.broadcast %cst_18 : f32 to vector<32x512xf32>
    %31 = arith.maximumf %29, %30 : vector<32x512xf32>
    %32 = vector.extract_strided_slice %15 {offsets = [1, 0], sizes = [1, 32], strides = [1, 1]} : vector<8x32xf32> to vector<1x32xf32>
    %cst_19 = arith.constant dense<0.000000e+00> : vector<1x512xf32>
    %33 = tpu.matmul %32, %31, %cst_19 {dimension_numbers = #tpu.dot_dimension_numbers<[1], [0], [0], [1], [0, 0, 1, 1], [], []>} : vector<1x32xf32>, vector<32x512xf32>, vector<1x512xf32> -> vector<1x512xf32>
    %34 = vector.extract_strided_slice %16 {offsets = [1, 0], sizes = [1, 1], strides = [1, 1]} : vector<8x1xf32> to vector<1x1xf32>
    %35 = vector.broadcast %34 : vector<1x1xf32> to vector<1x512xf32>
    %36 = arith.addf %33, %35 : vector<1x512xf32>
    %37 = vector.extract_strided_slice %14 {offsets = [0, 2], sizes = [32, 1], strides = [1, 1]} : vector<32x8xf32> to vector<32x1xf32>
    %38 = vector.broadcast %37 : vector<32x1xf32> to vector<32x512xf32>
    %39 = arith.addf %10, %38 : vector<32x512xf32>
    %cst_20 = arith.constant 0.000000e+00 : f32
    %40 = vector.broadcast %cst_20 : f32 to vector<32x512xf32>
    %41 = arith.maximumf %39, %40 : vector<32x512xf32>
    %42 = vector.extract_strided_slice %15 {offsets = [2, 0], sizes = [1, 32], strides = [1, 1]} : vector<8x32xf32> to vector<1x32xf32>
    %cst_21 = arith.constant dense<0.000000e+00> : vector<1x512xf32>
    %43 = tpu.matmul %42, %41, %cst_21 {dimension_numbers = #tpu.dot_dimension_numbers<[1], [0], [0], [1], [0, 0, 1, 1], [], []>} : vector<1x32xf32>, vector<32x512xf32>, vector<1x512xf32> -> vector<1x512xf32>
    %44 = vector.extract_strided_slice %16 {offsets = [2, 0], sizes = [1, 1], strides = [1, 1]} : vector<8x1xf32> to vector<1x1xf32>
    %45 = vector.broadcast %44 : vector<1x1xf32> to vector<1x512xf32>
    %46 = arith.addf %43, %45 : vector<1x512xf32>
    %47 = vector.extract_strided_slice %14 {offsets = [0, 3], sizes = [32, 1], strides = [1, 1]} : vector<32x8xf32> to vector<32x1xf32>
    %48 = vector.broadcast %47 : vector<32x1xf32> to vector<32x512xf32>
    %49 = arith.addf %10, %48 : vector<32x512xf32>
    %cst_22 = arith.constant 0.000000e+00 : f32
    %50 = vector.broadcast %cst_22 : f32 to vector<32x512xf32>
    %51 = arith.maximumf %49, %50 : vector<32x512xf32>
    %52 = vector.extract_strided_slice %15 {offsets = [3, 0], sizes = [1, 32], strides = [1, 1]} : vector<8x32xf32> to vector<1x32xf32>
    %cst_23 = arith.constant dense<0.000000e+00> : vector<1x512xf32>
    %53 = tpu.matmul %52, %51, %cst_23 {dimension_numbers = #tpu.dot_dimension_numbers<[1], [0], [0], [1], [0, 0, 1, 1], [], []>} : vector<1x32xf32>, vector<32x512xf32>, vector<1x512xf32> -> vector<1x512xf32>
    %54 = vector.extract_strided_slice %16 {offsets = [3, 0], sizes = [1, 1], strides = [1, 1]} : vector<8x1xf32> to vector<1x1xf32>
    %55 = vector.broadcast %54 : vector<1x1xf32> to vector<1x512xf32>
    %56 = arith.addf %53, %55 : vector<1x512xf32>
    %57 = vector.extract_strided_slice %14 {offsets = [0, 4], sizes = [32, 1], strides = [1, 1]} : vector<32x8xf32> to vector<32x1xf32>
    %58 = vector.broadcast %57 : vector<32x1xf32> to vector<32x512xf32>
    %59 = arith.addf %10, %58 : vector<32x512xf32>
    %cst_24 = arith.constant 0.000000e+00 : f32
    %60 = vector.broadcast %cst_24 : f32 to vector<32x512xf32>
    %61 = arith.maximumf %59, %60 : vector<32x512xf32>
    %62 = vector.extract_strided_slice %15 {offsets = [4, 0], sizes = [1, 32], strides = [1, 1]} : vector<8x32xf32> to vector<1x32xf32>
    %cst_25 = arith.constant dense<0.000000e+00> : vector<1x512xf32>
    %63 = tpu.matmul %62, %61, %cst_25 {dimension_numbers = #tpu.dot_dimension_numbers<[1], [0], [0], [1], [0, 0, 1, 1], [], []>} : vector<1x32xf32>, vector<32x512xf32>, vector<1x512xf32> -> vector<1x512xf32>
    %64 = vector.extract_strided_slice %16 {offsets = [4, 0], sizes = [1, 1], strides = [1, 1]} : vector<8x1xf32> to vector<1x1xf32>
    %65 = vector.broadcast %64 : vector<1x1xf32> to vector<1x512xf32>
    %66 = arith.addf %63, %65 : vector<1x512xf32>
    %67 = vector.extract_strided_slice %14 {offsets = [0, 5], sizes = [32, 1], strides = [1, 1]} : vector<32x8xf32> to vector<32x1xf32>
    %68 = vector.broadcast %67 : vector<32x1xf32> to vector<32x512xf32>
    %69 = arith.addf %10, %68 : vector<32x512xf32>
    %cst_26 = arith.constant 0.000000e+00 : f32
    %70 = vector.broadcast %cst_26 : f32 to vector<32x512xf32>
    %71 = arith.maximumf %69, %70 : vector<32x512xf32>
    %72 = vector.extract_strided_slice %15 {offsets = [5, 0], sizes = [1, 32], strides = [1, 1]} : vector<8x32xf32> to vector<1x32xf32>
    %cst_27 = arith.constant dense<0.000000e+00> : vector<1x512xf32>
    %73 = tpu.matmul %72, %71, %cst_27 {dimension_numbers = #tpu.dot_dimension_numbers<[1], [0], [0], [1], [0, 0, 1, 1], [], []>} : vector<1x32xf32>, vector<32x512xf32>, vector<1x512xf32> -> vector<1x512xf32>
    %74 = vector.extract_strided_slice %16 {offsets = [5, 0], sizes = [1, 1], strides = [1, 1]} : vector<8x1xf32> to vector<1x1xf32>
    %75 = vector.broadcast %74 : vector<1x1xf32> to vector<1x512xf32>
    %76 = arith.addf %73, %75 : vector<1x512xf32>
    %77 = vector.extract_strided_slice %14 {offsets = [0, 6], sizes = [32, 1], strides = [1, 1]} : vector<32x8xf32> to vector<32x1xf32>
    %78 = vector.broadcast %77 : vector<32x1xf32> to vector<32x512xf32>
    %79 = arith.addf %10, %78 : vector<32x512xf32>
    %cst_28 = arith.constant 0.000000e+00 : f32
    %80 = vector.broadcast %cst_28 : f32 to vector<32x512xf32>
    %81 = arith.maximumf %79, %80 : vector<32x512xf32>
    %82 = vector.extract_strided_slice %15 {offsets = [6, 0], sizes = [1, 32], strides = [1, 1]} : vector<8x32xf32> to vector<1x32xf32>
    %cst_29 = arith.constant dense<0.000000e+00> : vector<1x512xf32>
    %83 = tpu.matmul %82, %81, %cst_29 {dimension_numbers = #tpu.dot_dimension_numbers<[1], [0], [0], [1], [0, 0, 1, 1], [], []>} : vector<1x32xf32>, vector<32x512xf32>, vector<1x512xf32> -> vector<1x512xf32>
    %84 = vector.extract_strided_slice %16 {offsets = [6, 0], sizes = [1, 1], strides = [1, 1]} : vector<8x1xf32> to vector<1x1xf32>
    %85 = vector.broadcast %84 : vector<1x1xf32> to vector<1x512xf32>
    %86 = arith.addf %83, %85 : vector<1x512xf32>
    %87 = vector.extract_strided_slice %14 {offsets = [0, 7], sizes = [32, 1], strides = [1, 1]} : vector<32x8xf32> to vector<32x1xf32>
    %88 = vector.broadcast %87 : vector<32x1xf32> to vector<32x512xf32>
    %89 = arith.addf %10, %88 : vector<32x512xf32>
    %cst_30 = arith.constant 0.000000e+00 : f32
    %90 = vector.broadcast %cst_30 : f32 to vector<32x512xf32>
    %91 = arith.maximumf %89, %90 : vector<32x512xf32>
    %92 = vector.extract_strided_slice %15 {offsets = [7, 0], sizes = [1, 32], strides = [1, 1]} : vector<8x32xf32> to vector<1x32xf32>
    %cst_31 = arith.constant dense<0.000000e+00> : vector<1x512xf32>
    %93 = tpu.matmul %92, %91, %cst_31 {dimension_numbers = #tpu.dot_dimension_numbers<[1], [0], [0], [1], [0, 0, 1, 1], [], []>} : vector<1x32xf32>, vector<32x512xf32>, vector<1x512xf32> -> vector<1x512xf32>
    %94 = vector.extract_strided_slice %16 {offsets = [7, 0], sizes = [1, 1], strides = [1, 1]} : vector<8x1xf32> to vector<1x1xf32>
    %95 = vector.broadcast %94 : vector<1x1xf32> to vector<1x512xf32>
    %96 = arith.addf %93, %95 : vector<1x512xf32>
    %97 = tpu.concatenate %26, %36, %46, %56, %66, %76, %86, %96 in 0 : vector<1x512xf32>, vector<1x512xf32>, vector<1x512xf32>, vector<1x512xf32>, vector<1x512xf32>, vector<1x512xf32>, vector<1x512xf32>, vector<1x512xf32> -> vector<8x512xf32>
    %c0_32 = arith.constant 0 : index
    %c0_33 = arith.constant 0 : index
    %98 = vector.load %arg8[%c0_32, %c0_33] : memref<8x512xf32, #tpu.memory_space<vmem>>, vector<8x512xf32>
    tpu.vector_store %arg8[%c0_32, %c0_33], %97 {strides = array<i32>} : memref<8x512xf32, #tpu.memory_space<vmem>>, vector<8x512xf32>,
    return
  }
}

</mosaic_0001>

<bundles_post_ra>
// kernel: tpu_custom_call.1
= control target key start
LH: loop header
LB: loop body
LE: loop exit
PB: predicated region body
PF: predicated region fallthrough
CT: control target
= control target key end

     0   :  { %vm77_vm0 = vcmask 1043456   ;;  %v2267_v3 = vmov 0   ;;  %v2268_v7 = vmov 0.0   ;;  %vm64_vm1 = vcmask 31744   ;;  %s2754_s0 = inlined_call_operand.vmem [shape: f32[4,512], index: 0, kind: input, shape index: {}]   ;;  %s2755_s1 = inlined_call_operand.vmem [shape: f32[32,4], index: 1, kind: input, shape index: {}]   ;;  %s2756_s2 = inlined_call_operand.vmem [shape: f32[32,1], index: 2, kind: input, shape index: {}]   ;;  %s2757_s3 = inlined_call_operand.vmem [shape: f32[32,8], index: 3, kind: input, shape index: {}]   ;;  %s2758_s4 = inlined_call_operand.vmem [shape: f32[32,1], index: 4, kind: input, shape index: {}]   ;;  %s2759_s5 = inlined_call_operand.vmem [shape: f32[32,1], index: 5, kind: input, shape index: {}]   ;;  %s2760_s6 = inlined_call_operand.vmem [shape: f32[8,32], index: 6, kind: input, shape index: {}]   ;;  %s2761_s7 = inlined_call_operand.vmem [shape: f32[8,1], index: 7, kind: input, shape index: {}]   ;;  %s2762_s8 = inlined_call_operand.hbm [shape: f32[8,512], index: 8, kind: output, shape index: {}]  }
   0x1   :  { %v326_v0 = vld [vmem:[%s2758_s4 + $0x10] sm:$0xff]  ;;  %v324_v1 = vld [vmem:[%s2758_s4] sm:$0xff]  ;;  %2225 = vset.pattern.permute.xlu1 %v2267_v3  ;;  %2224 = vset.pattern.permute.xlu0 %v2267_v3  ;;  %v31_v5 = vld [vmem:[%s2754_s0 + $0x8] sm:$0xff] }
   0x2   :  { %v30_v2 = vld [vmem:[%s2754_s0] sm:$0xff]  ;;  %340 = vperm.xlu1 %2225, %v326_v0   ;;  %330 = vperm.xlu0 %2224, %v324_v1   ;;  %v63_v6 = vcombine.high %v31_v5, %v31_v5  ;;  %v327_v9 = vld [vmem:[%s2758_s4 + $0x18] sm:$0xff]  ;;  %v325_v10 = vld [vmem:[%s2758_s4 + $0x8] sm:$0xff] }
   0x3   :  { %v62_v4 = vcombine.high %v30_v2, %v30_v2  ;;  %150 = vmatprep.mubr.f32.mxu0 %v2268_v7  ;;  %v32_v8 = vld [vmem:[%s2755_s1] sm:$0xff]  ;;  %239 = vmatprep.mubr.f32.mxu1 %v2268_v7  ;;  %v33_v11 = vld [vmem:[%s2755_s1 + $0x8] sm:$0xff] }
   0x4   :  { %2064 = vmatprep.subr.msk.mxu1 %vm77_vm0, %v63_v6 }
   0x5   :  { %2058 = vmatprep.subr.msk.mxu0 %vm77_vm0, %v62_v4  ;;  %2065 = vmatpush1.msk.msra.mxu1 %vm77_vm0, %v31_v5 }
   0x6   :  { %2059 = vmatpush1.msk.msra.mxu0 %vm77_vm0, %v30_v2  ;;  %2066 = vmatmul.mubr.msk.f32.vlgmr.msra.gmra.mrb[0].mxu1 %vm64_vm1, %v32_v8 }
   0x7   :  { %2060 = vmatmul.mubr.msk.f32.vlgmr.msra.gmra.mrb[0].mxu0 %vm64_vm1, %v32_v8  ;;  %345 = vperm.xlu1 %2225, %v327_v9  }
   0x8   :  { %335 = vperm.xlu0 %2224, %v325_v10  }
   0x9   :  { %13 = vsyncpa [#allocation3], 0  ;;  %156 = vmatprep.mubr.f32.mxu0 %v2268_v7  ;;  %245 = vmatprep.mubr.f32.mxu1 %v2268_v7  ;;  %v37_v12 = vld [vmem:[%s2756_s2 + $0x8] sm:$0xff]  ;;  %v36_v13 = vld [vmem:[%s2756_s2] sm:$0xff]  ;;  %v2269_v34 = vmov 1   ;;  %v2270_v35 = vmov 2  }
   0xa   :  { %2067 = vmatmul.mubr.msk.f32.gmra.mrb[2].mxu1 %vm64_vm1, %v33_v11  ;;  %v34_v14 = vld [vmem:[%s2755_s1 + $0x10] sm:$0xff]  ;;  %v39_v15 = vld [vmem:[%s2756_s2 + $0x18] sm:$0xff]  ;;  %v281_v18 = vld [vmem:[%s2759_s5 + $0x8] sm:$0xff]  ;;  %v2271_v36 = vmov 3   ;;  %v2272_v37 = vmov 4   ;;  %v2273_v38 = vmov 5  }
   0xb   :  { %2061 = vmatmul.mubr.msk.f32.gmra.mrb[2].mxu0 %vm64_vm1, %v33_v11  ;;  %47 = vperm.xlu1 %2225, %v37_v12   ;;  %v38_v16 = vld [vmem:[%s2756_s2 + $0x10] sm:$0xff]  ;;  %v35_v17 = vld [vmem:[%s2755_s1 + $0x18] sm:$0xff]  ;;  %v280_v19 = vld [vmem:[%s2759_s5] sm:$0xff]  ;;  %v2274_v39 = vmov 6   ;;  %v2275_v40 = vmov 7   ;;  %vm411_vm2 = vcmask 261120  }
   0xc   :  { %42 = vperm.xlu0 %2224, %v36_v13   ;;  %162 = vmatprep.mubr.f32.mxu0 %v2268_v7  ;;  %v283_v20 = vld [vmem:[%s2759_s5 + $0x18] sm:$0xff]  ;;  %v282_v21 = vld [vmem:[%s2759_s5 + $0x10] sm:$0xff]  ;;  %v320_v22 = vld [vmem:[%s2757_s3] sm:$0xff]  ;;  %vm2006_vm3 = vcmask 1040384   ;;  %vm2011_vm4 = vcmask 1041408   ;;  %vm2016_vm5 = vcmask 1042432  }
   0xd   :  { %251 = vmatprep.mubr.f32.mxu1 %v2268_v7  ;;  %v322_v23 = vld [vmem:[%s2757_s3 + $0x10] sm:$0xff]  ;;  %v321_v28 = vld [vmem:[%s2757_s3 + $0x8] sm:$0xff]  ;;  %v323_v31 = vld [vmem:[%s2757_s3 + $0x18] sm:$0xff]  ;;  %vm2025_vm6 = vcmask 1044480   ;;  %vm2030_vm7 = vcmask 1045504   ;;  %vm2035_vm8 = vcmask 1046528  }
   0xe   :  { %2068 = vmatmul.mubr.msk.f32.gmra.mrb[4].mxu1 %vm64_vm1, %v34_v14  ;;  %v353_v53 = vld [vmem:[%s2761_s7] sm:$0xff] }
   0xf   :  { %2062 = vmatmul.mubr.msk.f32.gmra.mrb[4].mxu0 %vm64_vm1, %v34_v14  ;;  %57 = vperm.xlu1 %2225, %v39_v15  }
  0x10   :  { %52 = vperm.xlu0 %2224, %v38_v16   ;;  %168 = vmatprep.mubr.f32.mxu0 %v2268_v7 }
  0x11   :  { %257 = vmatprep.mubr.f32.mxu1 %v2268_v7 }
  0x12   :  { %2069 = vmatmul.mubr.msk.f32.gmra.mrb[6].mxu1 %vm64_vm1, %v35_v17 }
  0x13   :  { %2063 = vmatmul.mubr.msk.f32.gmra.mrb[6].mxu0 %vm64_vm1, %v35_v17  ;;  %291 = vperm.xlu1 %2225, %v281_v18  }
  0x14   :  { %286 = vperm.xlu0 %2224, %v280_v19   ;;  %479 = vmatprep.mubr.f32.mxu0 %v2268_v7 }
  0x15   :  { %550 = vmatprep.mubr.f32.mxu1 %v2268_v7 }
  0x17   :  { %301 = vperm.xlu1 %2225, %v283_v20  }
  0x18   :  { %296 = vperm.xlu0 %2224, %v282_v21  }
  0x81   :  { %v331_v24 = vpop.permute.xlu0 %330  ;;  %v341_v25 = vpop.permute.xlu1 %340 }
  0x82   :  { %v348_v26 = vadd.f32 %v331_v24, %v320_v22  ;;  %v350_v27 = vadd.f32 %v341_v25, %v322_v23 }
  0x84   :  { %356 = vperm.xlu0 %2224, %v348_v26  }
  0x86   :  { %v346_v32 = vpop.permute.xlu1 %345 }
  0x87   :  { %v336_v29 = vpop.permute.xlu0 %335  ;;  %v351_v33 = vadd.f32 %v346_v32, %v323_v31 }
  0x88   :  { %v349_v30 = vadd.f32 %v336_v29, %v321_v28  ;;  %366 = vperm.xlu0 %2224, %v350_v27  }
  0x8a   :  { %361 = vperm.xlu1 %2225, %v349_v30   ;;  %v48_v59 = vpop.permute.xlu1 %47 }
  0x8b   :  { %v43_v58 = vpop.permute.xlu0 %42 }
  0x8c   :  { %2226 = vset.pattern.permute.xlu0 %v2269_v34 }
  0x8d   :  { %558 = vperm.xlu0 %2226, %v348_v26  }
  0x8e   :  { %371 = vperm.xlu1 %2225, %v351_v33   ;;  %v58_v61 = vpop.permute.xlu1 %57 }
  0x8f   :  { %v53_v60 = vpop.permute.xlu0 %52 }
  0x91   :  { %570 = vperm.xlu0 %2226, %v351_v33  }
  0x92   :  { %2227 = vset.pattern.permute.xlu1 %v2269_v34  ;;  %v292_v5 = vpop.permute.xlu1 %291 }
  0x93   :  { %562 = vperm.xlu1 %2227, %v349_v30   ;;  %v287_v62 = vpop.permute.xlu0 %286 }
  0x95   :  { %2229 = vset.pattern.permute.xlu0 %v2270_v35 }
  0x96   :  { %757 = vperm.xlu0 %2229, %v349_v30   ;;  %v302_v31 = vpop.permute.xlu1 %301 }
  0x97   :  { %566 = vperm.xlu1 %2227, %v350_v27   ;;  %v297_v9 = vpop.permute.xlu0 %296 }
  0x9a   :  { %2230 = vset.pattern.permute.xlu0 %v2271_v36 }
  0x9b   :  { %2228 = vset.pattern.permute.xlu1 %v2270_v35  ;;  %948 = vperm.xlu0 %2230, %v348_v26  }
  0x9c   :  { %753 = vperm.xlu1 %2228, %v348_v26  }
  0x9f   :  { %960 = vperm.xlu0 %2230, %v351_v33  }
  0xa0   :  { %761 = vperm.xlu1 %2228, %v350_v27  }
  0xa3   :  { %2233 = vset.pattern.permute.xlu0 %v2272_v37 }
  0xa4   :  { %765 = vperm.xlu1 %2228, %v351_v33   ;;  %1147 = vperm.xlu0 %2233, %v349_v30  }
  0xa8   :  { %2231 = vset.pattern.permute.xlu1 %v2271_v36  ;;  %2234 = vset.pattern.permute.xlu0 %v2273_v38 }
  0xa9   :  { %952 = vperm.xlu1 %2231, %v349_v30   ;;  %1338 = vperm.xlu0 %2234, %v348_v26  }
  0xad   :  { %956 = vperm.xlu1 %2231, %v350_v27   ;;  %1350 = vperm.xlu0 %2234, %v351_v33  }
  0xb1   :  { %2232 = vset.pattern.permute.xlu1 %v2272_v37  ;;  %2237 = vset.pattern.permute.xlu0 %v2274_v39 }
  0xb2   :  { %1143 = vperm.xlu1 %2232, %v348_v26   ;;  %1537 = vperm.xlu0 %2237, %v349_v30  }
  0xb6   :  { %1151 = vperm.xlu1 %2232, %v350_v27   ;;  %2238 = vset.pattern.permute.xlu0 %v2275_v40 }
  0xb7   :  { %1728 = vperm.xlu0 %2238, %v348_v26  }
  0xba   :  { %1155 = vperm.xlu1 %2232, %v351_v33  }
  0xbb   :  { %1740 = vperm.xlu0 %2238, %v351_v33  }
  0xbe   :  { %2235 = vset.pattern.permute.xlu1 %v2273_v38 }
  0xbf   :  { %1342 = vperm.xlu1 %2235, %v349_v30  }
  0xc3   :  { %1346 = vperm.xlu1 %2235, %v350_v27  }
  0xc7   :  { %2236 = vset.pattern.permute.xlu1 %v2274_v39 }
  0xc8   :  { %1533 = vperm.xlu1 %2236, %v348_v26  }
  0xcc   :  { %1541 = vperm.xlu1 %2236, %v350_v27  }
  0xd0   :  { %1545 = vperm.xlu1 %2236, %v351_v33  }
  0xd4   :  { %2239 = vset.pattern.permute.xlu1 %v2275_v40 }
  0xd5   :  { %1732 = vperm.xlu1 %2239, %v349_v30  }
  0xd9   :  { %1736 = vperm.xlu1 %2239, %v350_v27   ;;  %v241_v42 = vpop.f32.mrb[0].mxu1 }
  0xda   :  { %v152_v41 = vpop.f32.mrb[0].mxu0  ;;  %v243_v44 = vpop.f32.mrb[1].mxu1  ;;  %v242_v0 = vadd.f32 %v241_v42, %v43_v58 }
  0xdb   :  { %v154_v43 = vpop.f32.mrb[1].mxu0  ;;  %v153_v63 = vadd.f32 %v152_v41, %v43_v58  ;;  %v244_v2 = vadd.f32 %v243_v44, %v43_v58 }
  0xdc   :  { %v155_v1 = vadd.f32 %v154_v43, %v43_v58  ;;  %v266_v15 = vmax.f32 %v242_v0, 0.0 }
  0xdd   :  { %2240 = vset.pattern.permute.xlu1 %v2267_v3  ;;  %v247_v46 = vpop.f32.mrb[2].mxu1  ;;  %v264_v14 = vmax.f32 %v153_v63, 0.0  ;;  %v267_v19 = vmax.f32 %v244_v2, 0.0 }
  0xde   :  { %v158_v45 = vpop.f32.mrb[2].mxu0  ;;  %v249_v48 = vpop.f32.mrb[3].mxu1  ;;  %408 = vperm.xlu1 %2240, %v353_v53   ;;  %v248_v4 = vadd.f32 %v247_v46, %v48_v59  ;;  %v265_v18 = vmax.f32 %v155_v1, 0.0  ;;  %v2418_v33 = vmul.f32 %v287_v62, %v266_v15 }
  0xdf   :  { %v160_v47 = vpop.f32.mrb[3].mxu0  ;;  %v159_v3 = vadd.f32 %v158_v45, %v48_v59  ;;  %v250_v8 = vadd.f32 %v249_v48, %v48_v59  ;;  %v2416_v32 = vmul.f32 %v287_v62, %v264_v14  ;;  %v2422_v37 = vmul.f32 %v287_v62, %v267_v19 }
  0xe0   :  { %v161_v6 = vadd.f32 %v160_v47, %v48_v59  ;;  %v270_v21 = vmax.f32 %v248_v4, 0.0  ;;  %v2420_v36 = vmul.f32 %v287_v62, %v265_v18 }
  0xe1   :  { %v253_v50 = vpop.f32.mrb[4].mxu1  ;;  %v268_v20 = vmax.f32 %v159_v3, 0.0  ;;  %v271_v23 = vmax.f32 %v250_v8, 0.0 }
  0xe2   :  { %v164_v49 = vpop.f32.mrb[4].mxu0  ;;  %v255_v52 = vpop.f32.mrb[5].mxu1  ;;  %v254_v11 = vadd.f32 %v253_v50, %v53_v60  ;;  %v269_v22 = vmax.f32 %v161_v6, 0.0  ;;  %v2426_v39 = vmul.f32 %v292_v5, %v270_v21 }
  0xe3   :  { %v166_v51 = vpop.f32.mrb[5].mxu0  ;;  %v165_v10 = vadd.f32 %v164_v49, %v53_v60  ;;  %v256_v13 = vadd.f32 %v255_v52, %v53_v60  ;;  %v2424_v38 = vmul.f32 %v292_v5, %v268_v20  ;;  %v2430_v41 = vmul.f32 %v292_v5, %v271_v23 }
  0xe4   :  { %v167_v12 = vadd.f32 %v166_v51, %v53_v60  ;;  %v274_v27 = vmax.f32 %v254_v11, 0.0  ;;  %v2428_v40 = vmul.f32 %v292_v5, %v269_v22 }
  0xe5   :  { %v259_v55 = vpop.f32.mrb[6].mxu1  ;;  %v272_v26 = vmax.f32 %v165_v10, 0.0  ;;  %v275_v29 = vmax.f32 %v256_v13, 0.0 }
  0xe6   :  { %v170_v54 = vpop.f32.mrb[6].mxu0  ;;  %v261_v57 = vpop.f32.mrb[7].mxu1  ;;  %v260_v17 = vadd.f32 %v259_v55, %v58_v61  ;;  %v273_v28 = vmax.f32 %v167_v12, 0.0  ;;  %v2434_v45 = vmul.f32 %v297_v9, %v274_v27 }
  0xe7   :  { %v172_v56 = vpop.f32.mrb[7].mxu0  ;;  %v171_v16 = vadd.f32 %v170_v54, %v58_v61  ;;  %v262_v25 = vadd.f32 %v261_v57, %v58_v61  ;;  %v2432_v44 = vmul.f32 %v297_v9, %v272_v26  ;;  %v2438_v47 = vmul.f32 %v297_v9, %v275_v29 }
  0xe8   :  { %v173_v24 = vadd.f32 %v172_v56, %v58_v61  ;;  %v278_v35 = vmax.f32 %v260_v17, 0.0  ;;  %v2436_v46 = vmul.f32 %v297_v9, %v273_v28 }
  0xe9   :  { %v276_v34 = vmax.f32 %v171_v16, 0.0  ;;  %v279_v43 = vmax.f32 %v262_v25, 0.0 }
  0xea   :  { %v277_v42 = vmax.f32 %v173_v24, 0.0  ;;  %v2442_v50 = vmul.f32 %v302_v31, %v278_v35 }
  0xeb   :  { %v2440_v49 = vmul.f32 %v302_v31, %v276_v34  ;;  %v2452_v59 = vmul.f32 %v302_v31, %v279_v43 }
  0xec   :  { %v2450_v58 = vmul.f32 %v302_v31, %v277_v42 }
 0x103   :  { %v357_v30 = vpop.permute.xlu0 %356 }
 0x104   :  { %v375_v51 = vadd.f32 %v357_v30, %v2420_v36  ;;  %v377_v52 = vadd.f32 %v357_v30, %v2422_v37  ;;  %v374_v60 = vadd.f32 %v357_v30, %v2416_v32  ;;  %v376_v61 = vadd.f32 %v357_v30, %v2418_v33 }
 0x106   :  { %v391_v8 = vmax.f32 %v375_v51, 0.0  ;;  %v393_v12 = vmax.f32 %v377_v52, 0.0  ;;  %v390_v13 = vmax.f32 %v374_v60, 0.0  ;;  %v392_v14 = vmax.f32 %v376_v61, 0.0 }
 0x107   :  { %v367_v48 = vpop.permute.xlu0 %366 }
 0x108   :  { %v382_v62 = vadd.f32 %v367_v48, %v2432_v44  ;;  %v383_v63 = vadd.f32 %v367_v48, %v2436_v46  ;;  %v385_v4 = vadd.f32 %v367_v48, %v2438_v47  ;;  %v384_v15 = vadd.f32 %v367_v48, %v2434_v45 }
 0x109   :  { %v362_v53 = vpop.permute.xlu1 %361 }
 0x10a   :  { %v378_v54 = vadd.f32 %v362_v53, %v2424_v38  ;;  %v379_v55 = vadd.f32 %v362_v53, %v2428_v40  ;;  %v380_v56 = vadd.f32 %v362_v53, %v2426_v39  ;;  %v381_v57 = vadd.f32 %v362_v53, %v2430_v41 }
 0x10b   :  { %v398_v17 = vmax.f32 %v382_v62, 0.0  ;;  %v399_v20 = vmax.f32 %v383_v63, 0.0  ;;  %v401_v25 = vmax.f32 %v385_v4, 0.0  ;;  %v400_v43 = vmax.f32 %v384_v15, 0.0 }
 0x10c   :  { %v395_v0 = vmax.f32 %v379_v55, 0.0  ;;  %v397_v1 = vmax.f32 %v381_v57, 0.0  ;;  %v394_v2 = vmax.f32 %v378_v54, 0.0  ;;  %v396_v3 = vmax.f32 %v380_v56, 0.0  ;;  %v559_v6 = vpop.permute.xlu0 %558 }
 0x10d   :  { %v372_v5 = vpop.permute.xlu1 %371  ;;  %v573_v21 = vadd.f32 %v559_v6, %v2416_v32  ;;  %v574_v28 = vadd.f32 %v559_v6, %v2420_v36  ;;  %v575_v48 = vadd.f32 %v559_v6, %v2418_v33  ;;  %v576_v51 = vadd.f32 %v559_v6, %v2422_v37 }
 0x10e   :  { %v386_v9 = vadd.f32 %v372_v5, %v2440_v49  ;;  %v387_v10 = vadd.f32 %v372_v5, %v2450_v58  ;;  %v388_v11 = vadd.f32 %v372_v5, %v2442_v50  ;;  %v389_v16 = vadd.f32 %v372_v5, %v2452_v59 }
 0x10f   :  { %v2086_v18 = vpack.c.bf16 %v395_v0, %v391_v8  ;;  %v2094_v19 = vpack.c.bf16 %v397_v1, %v393_v12  ;;  %v2088_v22 = vpack.c.bf16 %v394_v2, %v390_v13  ;;  %v2096_v23 = vpack.c.bf16 %v396_v3, %v392_v14 }
 0x110   :  { %v571_v24 = vpop.permute.xlu0 %570  ;;  %v402_v26 = vmax.f32 %v386_v9, 0.0  ;;  %v404_v27 = vmax.f32 %v388_v11, 0.0  ;;  %v403_v30 = vmax.f32 %v387_v10, 0.0  ;;  %v405_v42 = vmax.f32 %v389_v16, 0.0  ;;  %v2480_v10 = vld [vmem:[%s2760_s6] sm:$0xff]  ;;  %s2276_s6 = smov [#allocation2]  }
 0x111   :  { %2087 = vmatprep.subr.bf16.mxu0 %v2086_v18  ;;  %2095 = vmatprep.subr.bf16.mxu1 %v2094_v19  ;;  %v589_v53 = vmax.f32 %v573_v21, 0.0  ;;  %v585_v54 = vadd.f32 %v571_v24, %v2440_v49  ;;  %v590_v4 = vmax.f32 %v574_v28, 0.0  ;;  %v592_v8 = vmax.f32 %v576_v51, 0.0  ;;  %s2050_s22 = sshll.u32 %s2276_s6, 4  ;;  %s2051_s22 = int_to_ptr.vmem [resolvable:$true] %s2050_s22 }
 0x112   :  { %v563_v29 = vpop.permute.xlu1 %562  ;;  %2089 = vmatpush1.bf16.msra.mxu0 %v2088_v22  ;;  %2097 = vmatpush1.bf16.msra.mxu1 %v2096_v23  ;;  %v2090_v55 = vpack.c.bf16 %v403_v30, %v399_v20  ;;  %v2098_v56 = vpack.c.bf16 %v405_v42, %v401_v25  ;;  %v2092_v60 = vpack.c.bf16 %v402_v26, %v398_v17  ;;  %v591_v11 = vmax.f32 %v575_v48, 0.0  ;;  %s2243_s23 = scalar_lea.vmem %s2051_s22, 512  ;;  %p2248_p1 = scmp.lt.s32.totalorder %s2051_s22, %s2051_s22 }
 0x113   :  { %v577_v31 = vadd.f32 %v563_v29, %v2424_v38  ;;  %v578_v34 = vadd.f32 %v563_v29, %v2428_v40  ;;  %v579_v35 = vadd.f32 %v563_v29, %v2426_v39  ;;  %v580_v52 = vadd.f32 %v563_v29, %v2430_v41  ;;  %p2244_p0 = scmp.ne.s32.totalorder %s2051_s22, %s2243_s23  ;;  %p2249_p2 = scmp.lt.s32.totalorder %s2243_s23, %s2243_s23 }
 0x114   :  { %v2100_v61 = vpack.c.bf16 %v404_v27, %v400_v43  ;;  %2091 = vmatprep.subr.bf16.mxu0 %v2090_v55  ;;  %2099 = vmatprep.subr.bf16.mxu1 %v2098_v56  ;;  %v586_v12 = vadd.f32 %v571_v24, %v2450_v58  ;;  %v588_v13 = vadd.f32 %v571_v24, %v2452_v59  ;;  %v601_v23 = vmax.f32 %v585_v54, 0.0 }
 0x115   :  { %v593_v57 = vmax.f32 %v577_v31, 0.0  ;;  %v758_v63 = vpop.permute.xlu0 %757  ;;  %v594_v0 = vmax.f32 %v578_v34, 0.0  ;;  %v595_v1 = vmax.f32 %v579_v35, 0.0  ;;  %v596_v9 = vmax.f32 %v580_v52, 0.0  ;;  %p2250_p3 = por %p2249_p2, %p2248_p1 }
 0x116   :  { %v567_v62 = vpop.permute.xlu1 %566  ;;  %2093 = vmatpush1.bf16.msra.mxu0 %v2092_v60  ;;  %2101 = vmatpush1.bf16.msra.mxu1 %v2100_v61  ;;  %v587_v14 = vadd.f32 %v571_v24, %v2442_v50  ;;  %v772_v26 = vadd.f32 %v758_v63, %v2424_v38  ;;  %v773_v27 = vadd.f32 %v758_v63, %v2428_v40  ;;  %v602_v29 = vmax.f32 %v586_v12, 0.0 }
 0x117   :  { %v581_v2 = vadd.f32 %v567_v62, %v2432_v44  ;;  %v582_v3 = vadd.f32 %v567_v62, %v2436_v46  ;;  %v583_v5 = vadd.f32 %v567_v62, %v2434_v45  ;;  %v584_v6 = vadd.f32 %v567_v62, %v2438_v47  ;;  %p2251_p4 = pnand %p2250_p3, %p2244_p0 }
 0x118   :  { %v2102_v15 = vpack.c.bf16 %v594_v0, %v590_v4  ;;  %v2110_v16 = vpack.c.bf16 %v596_v9, %v592_v8  ;;  %v2104_v17 = vpack.c.bf16 %v593_v57, %v589_v53  ;;  %v2112_v19 = vpack.c.bf16 %v595_v1, %v591_v11 }
 0x119   :  { %v597_v18 = vmax.f32 %v581_v2, 0.0  ;;  %2070 = vmatmul.mubr.msk.f32.vlgmr.msra.gmra.mrb[8].mxu0 %vm411_vm2, %v2480_v10  ;;  %2071 = vmatmul.mubr.msk.f32.vlgmr.msra.gmra.mrb[8].mxu1 %vm411_vm2, %v2480_v10  ;;  %v598_v22 = vmax.f32 %v582_v3, 0.0  ;;  %v599_v25 = vmax.f32 %v583_v5, 0.0  ;;  %v600_v24 = vmax.f32 %v584_v6, 0.0 }
 0x11a   :  { %v2489_v21 = vpop.permute.xlu0 %948  ;;  %2103 = vmatprep.subr.bf16.mxu0 %v2102_v15  ;;  %2111 = vmatprep.subr.bf16.mxu1 %v2110_v16  ;;  %v604_v30 = vmax.f32 %v588_v13, 0.0  ;;  %v603_v31 = vmax.f32 %v587_v14, 0.0  ;;  %v774_v34 = vadd.f32 %v758_v63, %v2426_v39  ;;  %v775_v55 = vadd.f32 %v758_v63, %v2430_v41 }
 0x11b   :  { %v754_v20 = vpop.permute.xlu1 %753  ;;  %2105 = vmatpush1.bf16.msra.mxu0 %v2104_v17  ;;  %2113 = vmatpush1.bf16.msra.mxu1 %v2112_v19  ;;  %v2106_v48 = vpack.c.bf16 %v602_v29, %v598_v22  ;;  %v2108_v52 = vpack.c.bf16 %v601_v23, %v597_v18  ;;  %v605_v60 = vrot.slane %v2480_v10, 1  ;;  %v800_v61 = vrot.slane %v2480_v10, 2 }
 0x11c   :  { %v769_v28 = vadd.f32 %v754_v20, %v2420_v36  ;;  %v768_v35 = vadd.f32 %v754_v20, %v2416_v32  ;;  %v770_v42 = vadd.f32 %v754_v20, %v2418_v33  ;;  %674 = vmatprep.mubr.f32.mxu0 %v2268_v7  ;;  %745 = vmatprep.mubr.f32.mxu1 %v2268_v7  ;;  %v788_v62 = vmax.f32 %v772_v26, 0.0 }
 0x11d   :  { %v771_v43 = vadd.f32 %v754_v20, %v2422_v37  ;;  %v2114_v51 = vpack.c.bf16 %v604_v30, %v600_v24  ;;  %v2116_v56 = vpack.c.bf16 %v603_v31, %v599_v25  ;;  %2107 = vmatprep.subr.bf16.mxu0 %v2106_v48  ;;  %v790_v0 = vmax.f32 %v774_v34, 0.0 }
 0x11e   :  { %v2500_v54 = vpop.permute.xlu0 %960  ;;  %v785_v57 = vmax.f32 %v769_v28, 0.0  ;;  %v784_v1 = vmax.f32 %v768_v35, 0.0  ;;  %v786_v2 = vmax.f32 %v770_v42, 0.0  ;;  %v789_v5 = vmax.f32 %v773_v27, 0.0 }
 0x11f   :  { %v762_v53 = vpop.permute.xlu1 %761  ;;  %2115 = vmatprep.subr.bf16.mxu1 %v2114_v51  ;;  %2109 = vmatpush1.bf16.msra.mxu0 %v2108_v52  ;;  %v787_v63 = vmax.f32 %v771_v43, 0.0  ;;  %v791_v9 = vmax.f32 %v775_v55, 0.0  ;;  %v995_v17 = vrot.slane %v2480_v10, 3  ;;  %v1190_v22 = vrot.slane %v2480_v10, 4 }
 0x120   :  { %2117 = vmatpush1.bf16.msra.mxu1 %v2116_v56  ;;  %v776_v3 = vadd.f32 %v762_v53, %v2432_v44  ;;  %v777_v4 = vadd.f32 %v762_v53, %v2436_v46  ;;  %v779_v8 = vadd.f32 %v762_v53, %v2438_v47  ;;  %v2118_v13 = vpack.c.bf16 %v789_v5, %v785_v57 }
 0x121   :  { %v2126_v18 = vpack.c.bf16 %v791_v9, %v787_v63  ;;  %v2120_v19 = vpack.c.bf16 %v788_v62, %v784_v1  ;;  %v2128_v20 = vpack.c.bf16 %v790_v0, %v786_v2  ;;  %v963_v23 = vadd.f32 %v2489_v21, %v2416_v32 }
 0x122   :  { %2072 = vmatmul.mubr.msk.f32.vlgmr.msra.gmra.mrb[10].mxu0 %vm411_vm2, %v605_v60  ;;  %v964_v25 = vadd.f32 %v2489_v21, %v2420_v36  ;;  %v778_v26 = vadd.f32 %v762_v53, %v2434_v45  ;;  %2119 = vmatprep.subr.bf16.mxu0 %v2118_v13  ;;  %v1385_v24 = vrot.slane %v2480_v10, 5  ;;  %v965_v27 = vadd.f32 %v2489_v21, %v2418_v33 }
 0x123   :  { %v766_v6 = vpop.permute.xlu1 %765  ;;  %2073 = vmatmul.mubr.msk.f32.vlgmr.msra.gmra.mrb[10].mxu1 %vm411_vm2, %v605_v60  ;;  %v2514_v16 = vpop.permute.xlu0 %1147  ;;  %869 = vmatprep.mubr.f32.mxu0 %v2268_v7  ;;  %v966_v34 = vadd.f32 %v2489_v21, %v2422_v37  ;;  %v793_v43 = vmax.f32 %v777_v4, 0.0  ;;  %v792_v48 = vmax.f32 %v776_v3, 0.0  ;;  %v2533_v51 = vadd.f32 %v2500_v54, %v2440_v49 }
 0x124   :  { %v780_v11 = vadd.f32 %v766_v6, %v2440_v49  ;;  %v781_v12 = vadd.f32 %v766_v6, %v2450_v58  ;;  %v782_v14 = vadd.f32 %v766_v6, %v2442_v50  ;;  %v783_v15 = vadd.f32 %v766_v6, %v2452_v59  ;;  %940 = vmatprep.mubr.f32.mxu1 %v2268_v7 }
 0x125   :  { %2127 = vmatprep.subr.bf16.mxu1 %v2126_v18  ;;  %2121 = vmatpush1.bf16.msra.mxu0 %v2120_v19  ;;  %v795_v53 = vmax.f32 %v779_v8, 0.0  ;;  %v979_v55 = vmax.f32 %v963_v23, 0.0  ;;  %v794_v56 = vmax.f32 %v778_v26, 0.0  ;;  %v2538_v57 = vadd.f32 %v2500_v54, %v2442_v50 }
 0x126   :  { %v796_v28 = vmax.f32 %v780_v11, 0.0  ;;  %v797_v30 = vmax.f32 %v781_v12, 0.0  ;;  %v799_v31 = vmax.f32 %v783_v15, 0.0  ;;  %v798_v35 = vmax.f32 %v782_v14, 0.0  ;;  %2129 = vmatpush1.bf16.msra.mxu1 %v2128_v20 }
 0x127   :  { %v981_v62 = vmax.f32 %v965_v27, 0.0  ;;  %v976_v4 = vadd.f32 %v2500_v54, %v2450_v58  ;;  %v978_v8 = vadd.f32 %v2500_v54, %v2452_v59  ;;  %v991_v9 = vmax.f32 %v2533_v51, 0.0 }
 0x128   :  { %v953_v29 = vpop.permute.xlu1 %952  ;;  %v1339_v21 = vpop.permute.xlu0 %1338  ;;  %v2122_v60 = vpack.c.bf16 %v797_v30, %v793_v43  ;;  %v2130_v1 = vpack.c.bf16 %v799_v31, %v795_v53  ;;  %v2124_v2 = vpack.c.bf16 %v796_v28, %v792_v48  ;;  %v2132_v6 = vpack.c.bf16 %v798_v35, %v794_v56 }
 0x129   :  { %v967_v42 = vadd.f32 %v953_v29, %v2424_v38  ;;  %v969_v52 = vadd.f32 %v953_v29, %v2426_v39  ;;  %v968_v0 = vadd.f32 %v953_v29, %v2428_v40  ;;  %v970_v5 = vadd.f32 %v953_v29, %v2430_v41 }
 0x12a   :  { %2123 = vmatprep.subr.bf16.mxu0 %v2122_v60  ;;  %2131 = vmatprep.subr.bf16.mxu1 %v2130_v1  ;;  %v993_v13 = vmax.f32 %v2538_v57, 0.0  ;;  %v2551_v14 = vadd.f32 %v2514_v16, %v2424_v38  ;;  %v2555_v15 = vadd.f32 %v2514_v16, %v2428_v40  ;;  %v2560_v18 = vadd.f32 %v2514_v16, %v2426_v39 }
 0x12b   :  { %v983_v63 = vmax.f32 %v967_v42, 0.0  ;;  %v985_v11 = vmax.f32 %v969_v52, 0.0  ;;  %2125 = vmatpush1.bf16.msra.mxu0 %v2124_v2  ;;  %2133 = vmatpush1.bf16.msra.mxu1 %v2132_v6  ;;  %v980_v20 = vmax.f32 %v964_v25, 0.0  ;;  %v984_v23 = vmax.f32 %v968_v0, 0.0 }
 0x12c   :  { %v957_v3 = vpop.permute.xlu1 %956  ;;  %v1351_v27 = vpop.permute.xlu0 %1350  ;;  %v982_v28 = vmax.f32 %v966_v34, 0.0  ;;  %v986_v29 = vmax.f32 %v970_v5, 0.0  ;;  %v1165_v35 = vadd.f32 %v2514_v16, %v2430_v41  ;;  %v1178_v48 = vmax.f32 %v2551_v14, 0.0 }
 0x12d   :  { %v971_v12 = vadd.f32 %v957_v3, %v2432_v44  ;;  %v973_v54 = vadd.f32 %v957_v3, %v2434_v45  ;;  %v972_v19 = vadd.f32 %v957_v3, %v2436_v46  ;;  %v974_v26 = vadd.f32 %v957_v3, %v2438_v47 }
 0x12e   :  { %2074 = vmatmul.mubr.msk.f32.vlgmr.msra.gmra.mrb[12].mxu0 %vm411_vm2, %v800_v61  ;;  %v2136_v30 = vpack.c.bf16 %v983_v63, %v979_v55  ;;  %2075 = vmatmul.mubr.msk.f32.vlgmr.msra.gmra.mrb[12].mxu1 %vm411_vm2, %v800_v61  ;;  %v2134_v25 = vpack.c.bf16 %v984_v23, %v980_v20  ;;  %v2144_v43 = vpack.c.bf16 %v985_v11, %v981_v62  ;;  %v1180_v53 = vmax.f32 %v2560_v18, 0.0 }
 0x12f   :  { %v987_v42 = vmax.f32 %v971_v12, 0.0  ;;  %v2574_v51 = vadd.f32 %v1339_v21, %v2416_v32  ;;  %v989_v52 = vmax.f32 %v973_v54, 0.0  ;;  %v2142_v34 = vpack.c.bf16 %v986_v29, %v982_v28  ;;  %1064 = vmatprep.mubr.f32.mxu0 %v2268_v7  ;;  %1135 = vmatprep.mubr.f32.mxu1 %v2268_v7 }
 0x130   :  { %v2579_v16 = vadd.f32 %v1339_v21, %v2420_v36  ;;  %v2582_v55 = vadd.f32 %v1339_v21, %v2418_v33  ;;  %2135 = vmatprep.subr.bf16.mxu0 %v2134_v25  ;;  %v988_v57 = vmax.f32 %v972_v19, 0.0  ;;  %v992_v60 = vmax.f32 %v976_v4, 0.0 }
 0x131   :  { %v1144_v31 = vpop.permute.xlu1 %1143  ;;  %2143 = vmatprep.subr.bf16.mxu1 %v2142_v34  ;;  %2137 = vmatpush1.bf16.msra.mxu0 %v2136_v30  ;;  %v990_v62 = vmax.f32 %v974_v26, 0.0  ;;  %v994_v3 = vmax.f32 %v978_v8, 0.0  ;;  %v2140_v5 = vpack.c.bf16 %v991_v9, %v987_v42  ;;  %v2590_v63 = vadd.f32 %v1339_v21, %v2422_v37  ;;  %v2593_v11 = vpop.permute.xlu0 %1537 }
 0x132   :  { %v1158_v61 = vadd.f32 %v1144_v31, %v2416_v32  ;;  %v1160_v56 = vadd.f32 %v1144_v31, %v2418_v33  ;;  %2145 = vmatpush1.bf16.msra.mxu1 %v2144_v43  ;;  %v1159_v1 = vadd.f32 %v1144_v31, %v2420_v36  ;;  %v1161_v2 = vadd.f32 %v1144_v31, %v2422_v37 }
 0x133   :  { %v1369_v6 = vmax.f32 %v2574_v51, 0.0  ;;  %v2138_v12 = vpack.c.bf16 %v992_v60, %v988_v57  ;;  %v2148_v14 = vpack.c.bf16 %v993_v13, %v989_v52  ;;  %v1371_v4 = vmax.f32 %v2582_v55, 0.0 }
 0x134   :  { %v2597_v54 = vadd.f32 %v1351_v27, %v2440_v49  ;;  %v1174_v18 = vmax.f32 %v1158_v61, 0.0  ;;  %v2146_v19 = vpack.c.bf16 %v994_v3, %v990_v62  ;;  %v2600_v20 = vadd.f32 %v1351_v27, %v2450_v58 }
 0x135   :  { %v1152_v0 = vpop.permute.xlu1 %1151  ;;  %v2603_v8 = vadd.f32 %v1351_v27, %v2442_v50  ;;  %v2606_v21 = vadd.f32 %v1351_v27, %v2452_v59  ;;  %v1176_v9 = vmax.f32 %v1160_v56, 0.0  ;;  %2139 = vmatprep.subr.bf16.mxu0 %v2138_v12  ;;  %v2610_v13 = vadd.f32 %v2593_v11, %v2424_v38 }
 0x136   :  { %2147 = vmatprep.subr.bf16.mxu1 %v2146_v19  ;;  %2141 = vmatpush1.bf16.msra.mxu0 %v2140_v5  ;;  %v1175_v26 = vmax.f32 %v1159_v1, 0.0  ;;  %v1179_v28 = vmax.f32 %v2555_v15, 0.0  ;;  %v1177_v29 = vmax.f32 %v1161_v2, 0.0  ;;  %v2615_v30 = vadd.f32 %v2593_v11, %v2428_v40 }
 0x137   :  { %2149 = vmatpush1.bf16.msra.mxu1 %v2148_v14  ;;  %v1166_v27 = vadd.f32 %v1152_v0, %v2432_v44  ;;  %v1181_v31 = vmax.f32 %v1165_v35, 0.0  ;;  %v1168_v25 = vadd.f32 %v1152_v0, %v2434_v45  ;;  %v2152_v34 = vpack.c.bf16 %v1178_v48, %v1174_v18 }
 0x138   :  { %v2150_v43 = vpack.c.bf16 %v1179_v28, %v1175_v26  ;;  %v1167_v61 = vadd.f32 %v1152_v0, %v2436_v46  ;;  %v2160_v57 = vpack.c.bf16 %v1180_v53, %v1176_v9  ;;  %v1169_v35 = vadd.f32 %v1152_v0, %v2438_v47 }
 0x139   :  { %v1156_v23 = vpop.permute.xlu1 %1155  ;;  %2076 = vmatmul.mubr.msk.f32.vlgmr.msra.gmra.mrb[14].mxu0 %vm411_vm2, %v995_v17  ;;  %v2158_v15 = vpack.c.bf16 %v1181_v31, %v1177_v29  ;;  %v1381_v2 = vmax.f32 %v2597_v54, 0.0  ;;  %v2634_v3 = vadd.f32 %v2593_v11, %v2430_v41  ;;  %v1182_v5 = vmax.f32 %v1166_v27, 0.0 }
 0x13a   :  { %v1170_v42 = vadd.f32 %v1156_v23, %v2440_v49  ;;  %v1172_v52 = vadd.f32 %v1156_v23, %v2442_v50  ;;  %v1171_v56 = vadd.f32 %v1156_v23, %v2450_v58  ;;  %2077 = vmatmul.mubr.msk.f32.vlgmr.msra.gmra.mrb[14].mxu1 %vm411_vm2, %v995_v17  ;;  %2151 = vmatprep.subr.bf16.mxu0 %v2150_v43  ;;  %v1184_v17 = vmax.f32 %v1168_v25, 0.0 }
 0x13b   :  { %v1173_v60 = vadd.f32 %v1156_v23, %v2452_v59  ;;  %2159 = vmatprep.subr.bf16.mxu1 %v2158_v15  ;;  %2153 = vmatpush1.bf16.msra.mxu0 %v2152_v34  ;;  %v1183_v19 = vmax.f32 %v1167_v61, 0.0  ;;  %v1185_v23 = vmax.f32 %v1169_v35, 0.0  ;;  %v1370_v61 = vmax.f32 %v2579_v16, 0.0 }
 0x13c   :  { %v1186_v48 = vmax.f32 %v1170_v42, 0.0  ;;  %v1188_v62 = vmax.f32 %v1172_v52, 0.0  ;;  %2161 = vmatpush1.bf16.msra.mxu1 %v2160_v57  ;;  %1259 = vmatprep.mubr.f32.mxu0 %v2268_v7  ;;  %v1187_v9 = vmax.f32 %v1171_v56, 0.0  ;;  %v1372_v35 = vmax.f32 %v2590_v63, 0.0 }
 0x13d   :  { %1330 = vmatprep.mubr.f32.mxu1 %v2268_v7  ;;  %v1189_v26 = vmax.f32 %v1173_v60, 0.0  ;;  %v1383_v55 = vmax.f32 %v2603_v8, 0.0  ;;  %v1569_v8 = vmax.f32 %v2615_v30, 0.0 }
 0x13e   :  { %v1343_v1 = vpop.permute.xlu1 %1342  ;;  %v2156_v28 = vpack.c.bf16 %v1186_v48, %v1182_v5  ;;  %v2164_v29 = vpack.c.bf16 %v1188_v62, %v1184_v17  ;;  %v2154_v27 = vpack.c.bf16 %v1187_v9, %v1183_v19  ;;  %v1382_v5 = vmax.f32 %v2600_v20, 0.0 }
 0x13f   :  { %v1357_v53 = vadd.f32 %v1343_v1, %v2424_v38  ;;  %v1359_v0 = vadd.f32 %v1343_v1, %v2426_v39  ;;  %v1358_v12 = vadd.f32 %v1343_v1, %v2428_v40  ;;  %v1360_v14 = vadd.f32 %v1343_v1, %v2430_v41 }
 0x140   :  { %v2162_v52 = vpack.c.bf16 %v1189_v26, %v1185_v23  ;;  %2155 = vmatprep.subr.bf16.mxu0 %v2154_v27 }
 0x141   :  { %v1373_v54 = vmax.f32 %v1357_v53, 0.0  ;;  %v1375_v18 = vmax.f32 %v1359_v0, 0.0  ;;  %v1374_v15 = vmax.f32 %v1358_v12, 0.0  ;;  %v1376_v60 = vmax.f32 %v1360_v14, 0.0  ;;  %2157 = vmatpush1.bf16.msra.mxu0 %v2156_v28 }
 0x142   :  { %v1347_v31 = vpop.permute.xlu1 %1346  ;;  %2163 = vmatprep.subr.bf16.mxu1 %v2162_v52  ;;  %v1384_v12 = vmax.f32 %v2606_v21, 0.0 }
 0x143   :  { %v1361_v42 = vadd.f32 %v1347_v31, %v2432_v44  ;;  %v1362_v25 = vadd.f32 %v1347_v31, %v2436_v46  ;;  %v1363_v43 = vadd.f32 %v1347_v31, %v2434_v45  ;;  %v1364_v34 = vadd.f32 %v1347_v31, %v2438_v47  ;;  %2165 = vmatpush1.bf16.msra.mxu1 %v2164_v29 }
 0x144   :  { %v2166_v48 = vpack.c.bf16 %v1374_v15, %v1370_v61  ;;  %v2168_v62 = vpack.c.bf16 %v1373_v54, %v1369_v6  ;;  %v2176_v1 = vpack.c.bf16 %v1375_v18, %v1371_v4  ;;  %v2174_v0 = vpack.c.bf16 %v1376_v60, %v1372_v35  ;;  %2078 = vmatmul.mubr.msk.f32.vlgmr.msra.gmra.mrb[16].mxu0 %vm411_vm2, %v1190_v22  ;;  %v1729_v54 = vpop.permute.xlu0 %1728 }
 0x145   :  { %v1377_v56 = vmax.f32 %v1361_v42, 0.0  ;;  %v1379_v57 = vmax.f32 %v1363_v43, 0.0  ;;  %v1378_v53 = vmax.f32 %v1362_v25, 0.0  ;;  %v1380_v17 = vmax.f32 %v1364_v34, 0.0  ;;  %1454 = vmatprep.mubr.f32.mxu0 %v2268_v7 }
 0x146   :  { %2167 = vmatprep.subr.bf16.mxu0 %v2166_v48  ;;  %v1554_v4 = vadd.f32 %v2593_v11, %v2426_v39  ;;  %2175 = vmatprep.subr.bf16.mxu1 %v2174_v0  ;;  %v1571_v29 = vmax.f32 %v2634_v3, 0.0  ;;  %v1568_v31 = vmax.f32 %v2610_v13, 0.0  ;;  %v2677_v3 = vadd.f32 %v1729_v54, %v2416_v32 }
 0x147   :  { %v1534_v16 = vpop.permute.xlu1 %1533  ;;  %v2170_v20 = vpack.c.bf16 %v1382_v5, %v1378_v53  ;;  %v2178_v21 = vpack.c.bf16 %v1384_v12, %v1380_v17  ;;  %2079 = vmatmul.mubr.msk.f32.vlgmr.msra.gmra.mrb[16].mxu1 %vm411_vm2, %v1190_v22  ;;  %2169 = vmatpush1.bf16.msra.mxu0 %v2168_v62  ;;  %v2172_v19 = vpack.c.bf16 %v1381_v2, %v1377_v56 }
 0x148   :  { %v1548_v63 = vadd.f32 %v1534_v16, %v2416_v32  ;;  %v1549_v14 = vadd.f32 %v1534_v16, %v2420_v36  ;;  %v1550_v51 = vadd.f32 %v1534_v16, %v2418_v33  ;;  %v1551_v6 = vadd.f32 %v1534_v16, %v2422_v37  ;;  %2177 = vmatpush1.bf16.msra.mxu1 %v2176_v1  ;;  %v1741_v56 = vpop.permute.xlu0 %1740 }
 0x149   :  { %2171 = vmatprep.subr.bf16.mxu0 %v2170_v20  ;;  %v2180_v23 = vpack.c.bf16 %v1383_v55, %v1379_v57  ;;  %2179 = vmatprep.subr.bf16.mxu1 %v2178_v21  ;;  %v1570_v42 = vmax.f32 %v1554_v4, 0.0  ;;  %v2680_v52 = vadd.f32 %v1729_v54, %v2420_v36  ;;  %v2683_v34 = vadd.f32 %v1729_v54, %v2418_v33 }
 0x14a   :  { %v1564_v18 = vmax.f32 %v1548_v63, 0.0  ;;  %v1565_v9 = vmax.f32 %v1549_v14, 0.0  ;;  %v1566_v11 = vmax.f32 %v1550_v51, 0.0  ;;  %v1567_v28 = vmax.f32 %v1551_v6, 0.0  ;;  %1525 = vmatprep.mubr.f32.mxu1 %v2268_v7 }
 0x14b   :  { %v1542_v26 = vpop.permute.xlu1 %1541  ;;  %2173 = vmatpush1.bf16.msra.mxu0 %v2172_v19  ;;  %v1746_v5 = vadd.f32 %v1729_v54, %v2422_v37  ;;  %v1755_v17 = vadd.f32 %v1741_v56, %v2440_v49  ;;  %v1756_v12 = vadd.f32 %v1741_v56, %v2450_v58  ;;  %v1580_v63 = vrot.slane %v2480_v10, 6 }
 0x14c   :  { %v1556_v27 = vadd.f32 %v1542_v26, %v2432_v44  ;;  %v1557_v22 = vadd.f32 %v1542_v26, %v2436_v46  ;;  %v1558_v2 = vadd.f32 %v1542_v26, %v2434_v45  ;;  %v1559_v30 = vadd.f32 %v1542_v26, %v2438_v47  ;;  %2181 = vmatpush1.bf16.msra.mxu1 %v2180_v23 }
 0x14d   :  { %v2182_v25 = vpack.c.bf16 %v1569_v8, %v1565_v9  ;;  %v2190_v43 = vpack.c.bf16 %v1571_v29, %v1567_v28  ;;  %v2184_v13 = vpack.c.bf16 %v1568_v31, %v1564_v18  ;;  %v2192_v15 = vpack.c.bf16 %v1570_v42, %v1566_v11 }
 0x14e   :  { %v1572_v48 = vmax.f32 %v1556_v27, 0.0  ;;  %v1574_v36 = vmax.f32 %v1558_v2, 0.0  ;;  %2080 = vmatmul.mubr.msk.f32.vlgmr.msra.gmra.mrb[18].mxu0 %vm411_vm2, %v1385_v24  ;;  %v1573_v33 = vmax.f32 %v1557_v22, 0.0  ;;  %v1575_v62 = vmax.f32 %v1559_v30, 0.0 }
 0x14f   :  { %2183 = vmatprep.subr.bf16.mxu0 %v2182_v25  ;;  %v1546_v61 = vpop.permute.xlu1 %1545  ;;  %2191 = vmatprep.subr.bf16.mxu1 %v2190_v43  ;;  %v1759_v20 = vmax.f32 %v2677_v3, 0.0  ;;  %v1761_v21 = vmax.f32 %v2683_v34, 0.0  ;;  %v1757_v54 = vadd.f32 %v1741_v56, %v2442_v50  ;;  %v1758_v18 = vadd.f32 %v1741_v56, %v2452_v59 }
 0x150   :  { %v1560_v57 = vadd.f32 %v1546_v61, %v2440_v49  ;;  %v1561_v35 = vadd.f32 %v1546_v61, %v2450_v58  ;;  %v1562_v32 = vadd.f32 %v1546_v61, %v2442_v50  ;;  %v1563_v60 = vadd.f32 %v1546_v61, %v2452_v59  ;;  %2081 = vmatmul.mubr.msk.f32.vlgmr.msra.gmra.mrb[18].mxu1 %vm411_vm2, %v1385_v24 }
 0x151   :  { %2185 = vmatpush1.bf16.msra.mxu0 %v2184_v13  ;;  %2193 = vmatpush1.bf16.msra.mxu1 %v2192_v15  ;;  %v1771_v8 = vmax.f32 %v1755_v17, 0.0  ;;  %v1762_v23 = vmax.f32 %v1746_v5, 0.0  ;;  %v1773_v29 = vmax.f32 %v1757_v54, 0.0  ;;  %v1775_v13 = vrot.slane %v2480_v10, 7 }
 0x152   :  { %v1576_v1 = vmax.f32 %v1560_v57, 0.0  ;;  %v1578_v53 = vmax.f32 %v1562_v32, 0.0  ;;  %v1577_v0 = vmax.f32 %v1561_v35, 0.0  ;;  %v1579_v16 = vmax.f32 %v1563_v60, 0.0  ;;  %1649 = vmatprep.mubr.f32.mxu0 %v2268_v7  ;;  %1720 = vmatprep.mubr.f32.mxu1 %v2268_v7 }
 0x154   :  { %v1733_v14 = vpop.permute.xlu1 %1732  ;;  %v2186_v51 = vpack.c.bf16 %v1577_v0, %v1573_v33  ;;  %v2194_v6 = vpack.c.bf16 %v1579_v16, %v1575_v62  ;;  %v2188_v24 = vpack.c.bf16 %v1576_v1, %v1572_v48  ;;  %v2196_v55 = vpack.c.bf16 %v1578_v53, %v1574_v36 }
 0x155   :  { %v1747_v4 = vadd.f32 %v1733_v14, %v2424_v38  ;;  %v1748_v37 = vadd.f32 %v1733_v14, %v2428_v40  ;;  %v1749_v49 = vadd.f32 %v1733_v14, %v2426_v39  ;;  %v1750_v58 = vadd.f32 %v1733_v14, %v2430_v41 }
 0x156   :  { %2187 = vmatprep.subr.bf16.mxu0 %v2186_v51  ;;  %2195 = vmatprep.subr.bf16.mxu1 %v2194_v6  ;;  %v1772_v39 = vmax.f32 %v1756_v12, 0.0  ;;  %v1760_v41 = vmax.f32 %v2680_v52, 0.0 }
 0x157   :  { %v1763_v19 = vmax.f32 %v1747_v4, 0.0  ;;  %v1765_v9 = vmax.f32 %v1749_v49, 0.0  ;;  %2189 = vmatpush1.bf16.msra.mxu0 %v2188_v24  ;;  %2197 = vmatpush1.bf16.msra.mxu1 %v2196_v55  ;;  %v1764_v38 = vmax.f32 %v1748_v37, 0.0  ;;  %v1766_v40 = vmax.f32 %v1750_v58, 0.0 }
 0x158   :  { %v1737_v11 = vpop.permute.xlu1 %1736 }
 0x159   :  { %v1751_v26 = vadd.f32 %v1737_v11, %v2432_v44  ;;  %v1752_v50 = vadd.f32 %v1737_v11, %v2436_v46  ;;  %v1753_v59 = vadd.f32 %v1737_v11, %v2434_v45  ;;  %v1754_v28 = vadd.f32 %v1737_v11, %v2438_v47 }
 0x15a   :  { %2082 = vmatmul.mubr.msk.f32.vlgmr.msra.gmra.mrb[20].mxu0 %vm411_vm2, %v1580_v63  ;;  %2083 = vmatmul.mubr.msk.f32.vlgmr.msra.gmra.mrb[20].mxu1 %vm411_vm2, %v1580_v63  ;;  %v2198_v31 = vpack.c.bf16 %v1764_v38, %v1760_v41  ;;  %v2206_v27 = vpack.c.bf16 %v1766_v40, %v1762_v23  ;;  %v2200_v22 = vpack.c.bf16 %v1763_v19, %v1759_v20  ;;  %v1774_v44 = vmax.f32 %v1758_v18, 0.0 }
 0x15b   :  { %v1767_v2 = vmax.f32 %v1751_v26, 0.0  ;;  %v1769_v42 = vmax.f32 %v1753_v59, 0.0  ;;  %v2208_v30 = vpack.c.bf16 %v1765_v9, %v1761_v21  ;;  %v1768_v25 = vmax.f32 %v1752_v50, 0.0  ;;  %1844 = vmatprep.mubr.f32.mxu0 %v2268_v7  ;;  %1915 = vmatprep.mubr.f32.mxu1 %v2268_v7 }
 0x15c   :  { %2199 = vmatprep.subr.bf16.mxu0 %v2198_v31  ;;  %2207 = vmatprep.subr.bf16.mxu1 %v2206_v27  ;;  %v1770_v45 = vmax.f32 %v1754_v28, 0.0 }
 0x15d   :  { %2201 = vmatpush1.bf16.msra.mxu0 %v2200_v22  ;;  %2209 = vmatpush1.bf16.msra.mxu1 %v2208_v30  ;;  %v2202_v46 = vpack.c.bf16 %v1772_v39, %v1768_v25  ;;  %v2204_v47 = vpack.c.bf16 %v1771_v8, %v1767_v2  ;;  %v2212_v43 = vpack.c.bf16 %v1773_v29, %v1769_v42  ;;  %v2721_v15 = vpop.permute.xlu1 %408 }
 0x15e   :  { %v2210_v3 = vpack.c.bf16 %v1774_v44, %v1770_v45  ;;  %v606_v56 = vrot.slane %v2721_v15, 1  ;;  %v801_v24 = vrot.slane %v2721_v15, 2  ;;  %v996_v41 = vrot.slane %v2721_v15, 3 }
 0x15f   :  { %2203 = vmatprep.subr.bf16.mxu0 %v2202_v46 }
 0x160   :  { %2211 = vmatprep.subr.bf16.mxu1 %v2210_v3 }
 0x161   :  { %2205 = vmatpush1.bf16.msra.mxu0 %v2204_v47  ;;  %2213 = vmatpush1.bf16.msra.mxu1 %v2212_v43  ;;  %v1191_v47 = vrot.slane %v2721_v15, 4 }
 0x164   :  { %2084 = vmatmul.mubr.msk.f32.vlgmr.msra.gmra.mrb[22].mxu0 %vm411_vm2, %v1775_v13  ;;  %2085 = vmatmul.mubr.msk.f32.vlgmr.msra.gmra.mrb[22].mxu1 %vm411_vm2, %v1775_v13 }
 0x1ec   :  { %v481_v7 = vpop.f32.mrb[8].mxu0  ;;  %v552_v52 = vpop.f32.mrb[8].mxu1 }
 0x1ed   :  { %v483_v34 = vpop.f32.mrb[9].mxu0  ;;  %v554_v61 = vpop.f32.mrb[9].mxu1  ;;  %v482_v32 = vadd.f32 %v481_v7, %v2721_v15  ;;  %v553_v60 = vadd.f32 %v552_v52, %v2721_v15 }
 0x1ee   :  { %v484_v62 = vadd.f32 %v483_v34, %v2721_v15  ;;  %v555_v1 = vadd.f32 %v554_v61, %v2721_v15 }
 0x1f5   :  { %v676_v57 = vpop.f32.mrb[10].mxu0 }
 0x1f6   :  { %v747_v35 = vpop.f32.mrb[10].mxu1  ;;  %v677_v10 = vadd.f32 %v676_v57, %v606_v56  ;;  %v678_v36 = vpop.f32.mrb[11].mxu0 }
 0x1f7   :  { %v748_v48 = vadd.f32 %v747_v35, %v606_v56  ;;  %v749_v33 = vpop.f32.mrb[11].mxu1  ;;  %v679_v53 = vadd.f32 %v678_v36, %v606_v56 }
 0x1f8   :  { %v750_v0 = vadd.f32 %v749_v33, %v606_v56  ;;  %v1926_v16 = vrot.slane %v677_v10, 7 }
 0x1f9   :  { %v1928_v5 = vrot.slane %v748_v48, 7  ;;  %v1927_v17 = vrot.slane %v679_v53, 7  ;;  %v1386_v48 = vrot.slane %v2721_v15, 5 }
 0x1fa   :  { %v1929_v12 = vrot.slane %v750_v0, 7  ;;  %v2007_v63 = vsel %vm2006_vm3, %v482_v32, %v1926_v16 }
 0x1fb   :  { %v2009_v14 = vsel %vm2006_vm3, %v553_v60, %v1928_v5  ;;  %v2008_v51 = vsel %vm2006_vm3, %v484_v62, %v1927_v17 }
 0x1fc   :  { %v2010_v6 = vsel %vm2006_vm3, %v555_v1, %v1929_v12 }
 0x201   :  { %v871_v55 = vpop.f32.mrb[12].mxu0  ;;  %v942_v37 = vpop.f32.mrb[12].mxu1 }
 0x202   :  { %v872_v4 = vadd.f32 %v871_v55, %v801_v24  ;;  %v873_v49 = vpop.f32.mrb[13].mxu0  ;;  %v943_v58 = vadd.f32 %v942_v37, %v801_v24  ;;  %v944_v21 = vpop.f32.mrb[13].mxu1 }
 0x203   :  { %v874_v20 = vadd.f32 %v873_v49, %v801_v24  ;;  %v945_v18 = vadd.f32 %v944_v21, %v801_v24  ;;  %v1581_v49 = vrot.slane %v2721_v15, 6 }
 0x204   :  { %v1938_v54 = vrot.slane %v872_v4, 6  ;;  %v1940_v19 = vrot.slane %v943_v58, 6 }
 0x205   :  { %v1939_v9 = vrot.slane %v874_v20, 6  ;;  %v1941_v40 = vrot.slane %v945_v18, 6 }
 0x206   :  { %v2012_v38 = vsel %vm2011_vm4, %v2007_v63, %v1938_v54  ;;  %v2014_v8 = vsel %vm2011_vm4, %v2009_v14, %v1940_v19 }
 0x207   :  { %v2013_v39 = vsel %vm2011_vm4, %v2008_v51, %v1939_v9  ;;  %v2015_v11 = vsel %vm2011_vm4, %v2010_v6, %v1941_v40 }
 0x20c   :  { %v1066_v23 = vpop.f32.mrb[14].mxu0 }
 0x20d   :  { %v1067_v26 = vadd.f32 %v1066_v23, %v996_v41  ;;  %v1137_v50 = vpop.f32.mrb[14].mxu1  ;;  %v1068_v59 = vpop.f32.mrb[15].mxu0 }
 0x20e   :  { %v1138_v28 = vadd.f32 %v1137_v50, %v996_v41  ;;  %v1069_v29 = vadd.f32 %v1068_v59, %v996_v41  ;;  %v1139_v31 = vpop.f32.mrb[15].mxu1 }
 0x20f   :  { %v1950_v27 = vrot.slane %v1067_v26, 5  ;;  %v1140_v22 = vadd.f32 %v1139_v31, %v996_v41 }
 0x210   :  { %v1952_v2 = vrot.slane %v1138_v28, 5  ;;  %v1951_v42 = vrot.slane %v1069_v29, 5  ;;  %v1776_v28 = vrot.slane %v2721_v15, 7 }
 0x211   :  { %v2017_v30 = vsel %vm2016_vm5, %v2012_v38, %v1950_v27  ;;  %v1953_v25 = vrot.slane %v1140_v22, 5 }
 0x212   :  { %v2019_v44 = vsel %vm2016_vm5, %v2014_v8, %v1952_v2  ;;  %v2018_v45 = vsel %vm2016_vm5, %v2013_v39, %v1951_v42 }
 0x213   :  { %v2020_v46 = vsel %vm2016_vm5, %v2015_v11, %v1953_v25 }
 0x217   :  { %v1261_v43 = vpop.f32.mrb[16].mxu0 }
 0x218   :  { %v1262_v3 = vadd.f32 %v1261_v43, %v1191_v47  ;;  %v1263_v7 = vpop.f32.mrb[17].mxu0 }
 0x219   :  { %v1264_v34 = vadd.f32 %v1263_v7, %v1191_v47 }
 0x21a   :  { %v1332_v13 = vpop.f32.mrb[16].mxu1  ;;  %v1962_v56 = vrot.slane %v1262_v3, 4 }
 0x21b   :  { %v1333_v52 = vadd.f32 %v1332_v13, %v1191_v47  ;;  %v1334_v61 = vpop.f32.mrb[17].mxu1  ;;  %v1963_v32 = vrot.slane %v1264_v34, 4 }
 0x21c   :  { %v1335_v57 = vadd.f32 %v1334_v61, %v1191_v47  ;;  %v2021_v10 = vsel %vm77_vm0, %v2017_v30, %v1962_v56 }
 0x21d   :  { %v1964_v35 = vrot.slane %v1333_v52, 4  ;;  %v2022_v33 = vsel %vm77_vm0, %v2018_v45, %v1963_v32 }
 0x21e   :  { %v1965_v60 = vrot.slane %v1335_v57, 4 }
 0x21f   :  { %v2023_v36 = vsel %vm77_vm0, %v2019_v44, %v1964_v35 }
 0x220   :  { %v2024_v62 = vsel %vm77_vm0, %v2020_v46, %v1965_v60 }
 0x221   :  { %v1456_v1 = vpop.f32.mrb[18].mxu0 }
 0x222   :  { %v1457_v53 = vadd.f32 %v1456_v1, %v1386_v48  ;;  %v1458_v16 = vpop.f32.mrb[19].mxu0 }
 0x223   :  { %v1527_v0 = vpop.f32.mrb[18].mxu1  ;;  %v1459_v17 = vadd.f32 %v1458_v16, %v1386_v48 }
 0x224   :  { %v1528_v5 = vadd.f32 %v1527_v0, %v1386_v48  ;;  %v1529_v12 = vpop.f32.mrb[19].mxu1  ;;  %v1974_v63 = vrot.slane %v1457_v53, 3 }
 0x225   :  { %v1530_v14 = vadd.f32 %v1529_v12, %v1386_v48  ;;  %v1975_v6 = vrot.slane %v1459_v17, 3 }
 0x226   :  { %v1976_v51 = vrot.slane %v1528_v5, 3  ;;  %v2026_v24 = vsel %vm2025_vm6, %v2021_v10, %v1974_v63 }
 0x227   :  { %v1977_v55 = vrot.slane %v1530_v14, 3  ;;  %v2027_v37 = vsel %vm2025_vm6, %v2022_v33, %v1975_v6 }
 0x228   :  { %v2028_v4 = vsel %vm2025_vm6, %v2023_v36, %v1976_v51 }
 0x229   :  { %v2029_v58 = vsel %vm2025_vm6, %v2024_v62, %v1977_v55 }
 0x22d   :  { %v1651_v20 = vpop.f32.mrb[20].mxu0  ;;  %v1722_v21 = vpop.f32.mrb[20].mxu1 }
 0x22e   :  { %v1652_v54 = vadd.f32 %v1651_v20, %v1581_v49  ;;  %v1723_v18 = vadd.f32 %v1722_v21, %v1581_v49  ;;  %v1653_v19 = vpop.f32.mrb[21].mxu0  ;;  %v1724_v9 = vpop.f32.mrb[21].mxu1 }
 0x22f   :  { %v1654_v38 = vadd.f32 %v1653_v19, %v1581_v49  ;;  %v1725_v40 = vadd.f32 %v1724_v9, %v1581_v49 }
 0x230   :  { %v1986_v8 = vrot.slane %v1652_v54, 2  ;;  %v1988_v39 = vrot.slane %v1723_v18, 2 }
 0x231   :  { %v1987_v11 = vrot.slane %v1654_v38, 2  ;;  %v1989_v41 = vrot.slane %v1725_v40, 2 }
 0x232   :  { %v2031_v23 = vsel %vm2030_vm7, %v2026_v24, %v1986_v8  ;;  %v2033_v26 = vsel %vm2030_vm7, %v2028_v4, %v1988_v39 }
 0x233   :  { %v2032_v50 = vsel %vm2030_vm7, %v2027_v37, %v1987_v11  ;;  %v2034_v59 = vsel %vm2030_vm7, %v2029_v58, %v1989_v41 }
 0x237   :  { %v1846_v29 = vpop.f32.mrb[22].mxu0  ;;  %v1917_v31 = vpop.f32.mrb[22].mxu1 }
 0x238   :  { %v1847_v27 = vadd.f32 %v1846_v29, %v1776_v28  ;;  %v1918_v22 = vadd.f32 %v1917_v31, %v1776_v28  ;;  %v1848_v2 = vpop.f32.mrb[23].mxu0  ;;  %v1919_v42 = vpop.f32.mrb[23].mxu1 }
 0x239   :  { %v1849_v30 = vadd.f32 %v1848_v2, %v1776_v28  ;;  %v1920_v25 = vadd.f32 %v1919_v42, %v1776_v28 }
 0x23a   :  { %v1998_v44 = vrot.slane %v1847_v27, 1  ;;  %v2000_v45 = vrot.slane %v1918_v22, 1 }
 0x23b   :  { %v1999_v46 = vrot.slane %v1849_v30, 1  ;;  %v2001_v47 = vrot.slane %v1920_v25, 1 }
 0x23c   :  { %v2036_v43 = vsel %vm2035_vm8, %v2031_v23, %v1998_v44  ;;  %v2038_v3 = vsel %vm2035_vm8, %v2033_v26, %v2000_v45 }
 0x23d   :  { %2040 = vst [vmem:[#allocation2] sm:$0xff] %v2036_v43  ;;  %2042 = vst [vmem:[#allocation2 + $0x10] sm:$0xff] %v2038_v3  ;;  %v2037_v15 = vsel %vm2035_vm8, %v2032_v50, %v1999_v46  ;;  %v2039_v13 = vsel %vm2035_vm8, %v2034_v59, %v2001_v47 }
 0x23e   :  { %2041 = vst [vmem:[#allocation2 + $0x8] sm:$0xff] %v2037_v15  ;;  %2043 = vst [vmem:[#allocation2 + $0x18] sm:$0xff] %v2039_v13 }
 0x23f   :  { %2254 = shalt.err (!%p2251_p4)
}
 0x240   :  { %s2255_s26 = scalar_lea.hbm %s2762_s8, 512 }
 0x241   :  { %p2256_p5 = scmp.ne.s32.totalorder %s2762_s8, %s2255_s26  ;;  %p2259_p6 = scmp.lt.u32.totalorder %s2255_s26, %s2762_s8 }
 0x243   :  { %p2261_p7 = pnand %p2259_p6, %p2256_p5 }
 0x245   :  { %2264 = shalt.err (!%p2261_p7)
}
 0x246   :  { %2053 = dma.vmem_to_hbm [thread:$0]  %s2051_s22, 512, %s2762_s8, [#allocation3]  }
 0x247   :  { %2265 = dma.done.wait [#allocation3], 512  }
 0x248   :  { %2266 = vsyncadd [#allocation3], 4294966784 }
 0x249   :  { %2057 = vsyncpa [#allocation3], 1 }

</bundles_post_ra>
